<compile_context>
chip_gen: v7x
topology: tpu7x:2x2x1
jax: 0.10.0
libtpu: 0.0.40
codegen_flags: <defaults>
</compile_context>

<pallas_src>
import functools
import math

import jax
import jax.numpy as jnp
from jax.experimental import pallas as pl
from jax.experimental.pallas import tpu as pltpu


# ----------------------------------------------------------------------------
# Pallas kernels
# ----------------------------------------------------------------------------
def _linear_kernel(x_ref, w_ref, b_ref, o_ref, acc_ref):
    # One (bm, bk) x (bk, bn) contribution of o = x @ w + b.
    # bf16 operands on the MXU, f32 accumulation in VMEM scratch, f32 bias epilogue.
    @pl.when(pl.program_id(2) == 0)
    def _():
        acc_ref[...] = jnp.zeros_like(acc_ref)

    acc_ref[...] += jnp.dot(
        x_ref[...].astype(jnp.bfloat16),
        w_ref[...].astype(jnp.bfloat16),
        preferred_element_type=jnp.float32,
    )

    @pl.when(pl.program_id(2) == pl.num_programs(2) - 1)
    def _():
        o_ref[...] = (acc_ref[...] + b_ref[...]).astype(o_ref.dtype)


def _attention_kernel(q_ref, k_ref, v_ref, wo_ref, bo_ref, o_ref, *, num_heads):
    # One (batch, q-tile) step: all heads processed back-to-back, output
    # projection fused (Wo resident in VMEM).  Softmax scale is already folded
    # into the Q projection weights.
    tq = q_ref.shape[1]
    d_model = q_ref.shape[2]
    d = d_model // num_heads

    q = q_ref[0]          # (tq,  D) bf16
    k = k_ref[0]          # (Skv, D) bf16
    v = v_ref[0]          # (Skv, D) bf16

    ctx_heads = []
    for h in range(num_heads):                      # static unroll: MXU stays fed
        lo = h * d
        qh = q[:, lo:lo + d]                        # (tq,  d)
        kh = k[:, lo:lo + d]                        # (Skv, d)
        vh = v[:, lo:lo + d]                        # (Skv, d)

        # scores = qh @ kh^T  (contract over head dim), f32 accumulation
        s = jax.lax.dot_general(qh, kh, (((1,), (1,)), ((), ())),
                                preferred_element_type=jnp.float32)  # (tq, Skv)

        # numerically-stable softmax over the key axis
        m = jnp.max(s, axis=-1, keepdims=True)
        p = jnp.exp(s - m)
        l = jnp.sum(p, axis=-1, keepdims=True)
        attn = p * pl.reciprocal(l, approx=True)

        # TODO(synk): nn.Dropout(0.3) on `attn` is identity here (eval/inference
        # semantics); training-mode dropout would build a keep-mask in-kernel
        # with pltpu.prng_seed + pltpu.prng_random_bits.

        ctx_heads.append(jnp.dot(attn.astype(jnp.bfloat16), vh,
                                 preferred_element_type=jnp.float32))  # (tq, d)

    # Merge heads in-register (lane concat) and fuse the output projection.
    ctx = jnp.concatenate(ctx_heads, axis=-1).astype(jnp.bfloat16)      # (tq, D)
    out = jnp.dot(ctx, wo_ref[...].astype(jnp.bfloat16),
                  preferred_element_type=jnp.float32)                   # (tq, D)
    o_ref[0] = (out + bo_ref[...]).astype(o_ref.dtype)


# ----------------------------------------------------------------------------
# Wrappers (grids / BlockSpecs)
# ----------------------------------------------------------------------------
def _pick_tile(dim, candidates):
    for c in candidates:
        if dim % c == 0:
            return c
    return dim  # full extent (always legal: block dim == array dim)


def linear(x, w, b, out_dtype=jnp.float32):
    """x: (M, K) f32/bf16, w: (K, N) bf16, b: (N,) f32 -> (M, N) in out_dtype."""
    m, k_dim = x.shape
    n = w.shape[1]
    bm = _pick_tile(m, (256, 128, 64, 32, 16, 8))
    bn = _pick_tile(n, (512, 384, 256, 128))
    bk = _pick_tile(k_dim, (512, 256, 128))   # K-reduction tiles (v7x VMEM safety)
    b2 = b.reshape(1, n).astype(jnp.float32)

    return pl.pallas_call(
        _linear_kernel,
        out_shape=jax.ShapeDtypeStruct((m, n), out_dtype),
        grid=(m // bm, n // bn, k_dim // bk),
        in_specs=[
            pl.BlockSpec((bm, bk), lambda i, j, kk: (i, kk)),
            pl.BlockSpec((bk, bn), lambda i, j, kk: (kk, j)),
            pl.BlockSpec((1, bn), lambda i, j, kk: (0, j)),
        ],
        out_specs=pl.BlockSpec((bm, bn), lambda i, j, kk: (i, j)),
        scratch_shapes=[pltpu.VMEM((bm, bn), jnp.float32)],
        compiler_params=pltpu.CompilerParams(
            dimension_semantics=("parallel", "parallel", "arbitrary")),
    )(x, w, b2)


def attention_output(q_arr, k_arr, v_arr, wo, bo, *, num_heads, d_model,
                     q_off=0, k_off=0, v_off=0, out_dtype=jnp.float32):
    """Attention + fused output projection.

    q_arr: (B, S_q, *), k_arr/v_arr: (B, S_kv, *) in bf16; the D-wide column
    block at block offset {q,k,v}_off along the last axis is used (this lets
    a packed (B, S, 3D) QKV projection be consumed without any XLA slicing).
    Returns (B, S_q, D) = softmax((x Wq_scaled) (x Wk)^T) (x Wv) @ Wo + bo.
    """
    batch, s_q = q_arr.shape[0], q_arr.shape[1]
    s_kv = k_arr.shape[1]
    tq = _pick_tile(s_q, (128, 64, 32, 16, 8))   # query tiling bounds score VMEM
    # TODO(synk): for very long S_kv (v7x 64 MiB VMEM) add an online-softmax loop
    # over KV blocks instead of holding the full (tq, S_kv) scores.
    bo2 = bo.reshape(1, d_model).astype(jnp.float32)
    kernel = functools.partial(_attention_kernel, num_heads=num_heads)

    return pl.pallas_call(
        kernel,
        out_shape=jax.ShapeDtypeStruct((batch, s_q, d_model), out_dtype),
        grid=(batch, s_q // tq),
        in_specs=[
            pl.BlockSpec((1, tq, d_model), lambda b, i, o=q_off: (b, i, o)),
            pl.BlockSpec((1, s_kv, d_model), lambda b, i, o=k_off: (b, 0, o)),
            pl.BlockSpec((1, s_kv, d_model), lambda b, i, o=v_off: (b, 0, o)),
            pl.BlockSpec((d_model, d_model), lambda b, i: (0, 0)),   # Wo resident
            pl.BlockSpec((1, d_model), lambda b, i: (0, 0)),         # bo resident
        ],
        out_specs=pl.BlockSpec((1, tq, d_model), lambda b, i: (b, i, 0)),
        compiler_params=pltpu.CompilerParams(
            dimension_semantics=("parallel", "parallel")),
    )(q_arr, k_arr, v_arr, wo, bo2)


# ----------------------------------------------------------------------------
# MultiHeadedAttention forward
# ----------------------------------------------------------------------------
def multi_headed_attention(params, key, value, query):
    """key/value: (B, S_kv, D), query: (B, S_q, D) -> (B, S_q, D) f32."""
    H = params["head_count"]
    wk, bk = params["k"]
    wv, bv = params["v"]
    wq, bq = params["q"]
    wo, bo = params["out"]

    B, S_kv, D = key.shape
    S_q = query.shape[1]
    d = D // H
    scale = 1.0 / math.sqrt(d)
    bf = jnp.bfloat16

    # Weights cast to bf16 once in the wrapper; softmax scale folded into Wq/bq.
    wk_b = wk.astype(bf)
    wv_b = wv.astype(bf)
    wq_b = (wq * scale).astype(bf)
    bq_s = (bq * scale).astype(jnp.float32)
    wo_b = wo.astype(bf)

    if key is value and value is query:
        # Self-attention: single fused projection x @ [Wk | Wv | Wq*scale] (N = 3D).
        x2 = key.reshape(B * S_kv, D)
        w_kvq = jnp.concatenate([wk_b, wv_b, wq_b], axis=1)      # (D, 3D)
        b_kvq = jnp.concatenate([bk.astype(jnp.float32),
                                 bv.astype(jnp.float32), bq_s])  # (3D,)
        proj = linear(x2, w_kvq, b_kvq, out_dtype=bf).reshape(B, S_kv, 3 * D)
        return attention_output(proj, proj, proj, wo_b, bo,
                                num_heads=H, d_model=D,
                                k_off=0, v_off=1, q_off=2)

    # Cross-attention: separate projections (no activation stacking), bf16 outputs.
    k_p = linear(key.reshape(B * S_kv, D), wk_b, bk, out_dtype=bf).reshape(B, S_kv, D)
    v_p = linear(value.reshape(B * S_kv, D), wv_b, bv, out_dtype=bf).reshape(B, S_kv, D)
    q_p = linear(query.reshape(B * S_q, D), wq_b, bq_s, out_dtype=bf).reshape(B, S_q, D)
    return attention_output(q_p, k_p, v_p, wo_b, bo, num_heads=H, d_model=D)


# ----------------------------------------------------------------------------
# Deterministic synthetic parameters + pure-JAX reference
# ----------------------------------------------------------------------------
def init_params(rng, head_count, model_dim):
    assert model_dim % head_count == 0
    bound = 1.0 / math.sqrt(model_dim)

    def lin_init(k):
        k1, k2 = jax.random.split(k)
        w = jax.random.uniform(k1, (model_dim, model_dim), jnp.float32, -bound, bound)
        b = jax.random.uniform(k2, (model_dim,), jnp.float32, -bound, bound)
        return w, b

    kk, kv, kq, ko = jax.random.split(rng, 4)
    return {
        "head_count": head_count,
        "k": lin_init(kk),
        "v": lin_init(kv),
        "q": lin_init(kq),
        "out": lin_init(ko),
    }


def reference_mha(params, key, value, query):
    H = params["head_count"]
    B, S_kv, D = key.shape
    S_q = query.shape[1]
    d = D // H

    def lin(x, wb):
        w, b = wb
        return x @ w + b

    def split(x, s):
        return x.reshape(B, s, H, d).transpose(0, 2, 1, 3)

    k = split(lin(key, params["k"]), S_kv)
    v = split(lin(value, params["v"]), S_kv)
    q = split(lin(query, params["q"]), S_q) / math.sqrt(d)
    scores = jnp.einsum("bhqd,bhkd->bhqk", q, k)
    attn = jax.nn.softmax(scores, axis=-1)
    ctx = jnp.einsum("bhqk,bhkd->bhqd", attn, v)
    ctx = ctx.transpose(0, 2, 1, 3).reshape(B, S_q, D)
    return lin(ctx, params["out"])


if __name__ == "__main__":
    root = jax.random.PRNGKey(0)
    kp, k1, k2, k3 = jax.random.split(root, 4)

    # Small but lane-dense shapes: model_dim multiple of 128, seq multiple of 8.
    B, S, D, H = 2, 128, 128, 4
    params = init_params(kp, H, D)

    key_in = jax.random.normal(k1, (B, S, D), jnp.float32)
    val_in = jax.random.normal(k2, (B, S, D), jnp.float32)
    qry_in = jax.random.normal(k3, (B, S, D), jnp.float32)

    # Cross-attention path (distinct key / value / query).
    out = multi_headed_attention(params, key_in, val_in, qry_in)
    out = jax.block_until_ready(out)
    assert out.shape == (B, S, D), out.shape
    assert bool(jnp.all(jnp.isfinite(out)))
    ref = reference_mha(params, key_in, val_in, qry_in)
    err = float(jnp.max(jnp.abs(out - ref)))
    assert err < 0.1, f"cross-attention max abs error vs reference: {err}"

    # Self-attention path (fused QKV projection, packed column blocks).
    out_sa = multi_headed_attention(params, key_in, key_in, key_in)
    out_sa = jax.block_until_ready(out_sa)
    assert out_sa.shape == (B, S, D), out_sa.shape
    assert bool(jnp.all(jnp.isfinite(out_sa)))
    ref_sa = reference_mha(params, key_in, key_in, key_in)
    err_sa = float(jnp.max(jnp.abs(out_sa - ref_sa)))
    assert err_sa < 0.1, f"self-attention max abs error vs reference: {err_sa}"

    print("KERNEL_OK")
</pallas_src>

<mosaic_0001>
module attributes {stable_mosaic.version = 11 : i64} {
  func.func @_linear_kernel(%arg0: i32, %arg1: i32, %arg2: i32, %arg3: memref<256x128xf32, #tpu.memory_space<vmem>>, %arg4: memref<128x128xbf16, #tpu.memory_space<vmem>>, %arg5: memref<1x128xf32, #tpu.memory_space<vmem>>, %arg6: memref<256x128xbf16, #tpu.memory_space<vmem>>, %arg7: memref<256x128xf32, #tpu.memory_space<vmem>>) attributes {dimension_semantics = [#tpu.dimension_semantics<parallel>, #tpu.dimension_semantics<parallel>, #tpu.dimension_semantics<arbitrary>], iteration_bounds = array<i64: 1, 1, 1>, scalar_prefetch = 0 : i64, scratch_operands = 1 : i64, tpu.core_type = #tpu.core_type<tc>, window_params = [{transform_indices = @transform_0, window_bounds = array<i64: 256, 128>}, {transform_indices = @transform_1, window_bounds = array<i64: 128, 128>}, {transform_indices = @transform_2, window_bounds = array<i64: 1, 128>}, {transform_indices = @transform_3, window_bounds = array<i64: 256, 128>}]} {
    %c0_i32 = arith.constant 0 : i32
    %0 = arith.cmpi eq, %arg2, %c0_i32 : i32
    %1 = arith.extui %0 : i1 to i32
    %c0_i32_0 = arith.constant 0 : i32
    %2 = arith.cmpi ne, %1, %c0_i32_0 : i32
    scf.if %2 {
      %cst_10 = arith.constant 0.000000e+00 : f32
      %13 = vector.broadcast %cst_10 : f32 to vector<256x128xf32>
      %c0_11 = arith.constant 0 : index
      %c0_12 = arith.constant 0 : index
      %14 = vector.load %arg7[%c0_11, %c0_12] : memref<256x128xf32, #tpu.memory_space<vmem>>, vector<256x128xf32>
      tpu.vector_store %arg7[%c0_11, %c0_12], %13 {strides = array<i32>} : memref<256x128xf32, #tpu.memory_space<vmem>>, vector<256x128xf32>,
    } else {
    }
    %c0 = arith.constant 0 : index
    %c0_1 = arith.constant 0 : index
    %3 = vector.load %arg7[%c0, %c0_1] : memref<256x128xf32, #tpu.memory_space<vmem>>, vector<256x128xf32>
    %c0_2 = arith.constant 0 : index
    %c0_3 = arith.constant 0 : index
    %4 = vector.load %arg3[%c0_2, %c0_3] : memref<256x128xf32, #tpu.memory_space<vmem>>, vector<256x128xf32>
    %5 = arith.truncf %4 : vector<256x128xf32> to vector<256x128xbf16>
    %c0_4 = arith.constant 0 : index
    %c0_5 = arith.constant 0 : index
    %6 = vector.load %arg4[%c0_4, %c0_5] : memref<128x128xbf16, #tpu.memory_space<vmem>>, vector<128x128xbf16>
    %cst = arith.constant dense<0.000000e+00> : vector<256x128xf32>
    %7 = tpu.matmul %5, %6, %cst {dimension_numbers = #tpu.dot_dimension_numbers<[1], [0], [0], [1], [0, 0, 1, 1], [], []>} : vector<256x128xbf16>, vector<128x128xbf16>, vector<256x128xf32> -> vector<256x128xf32>
    %8 = arith.addf %3, %7 : vector<256x128xf32>
    %c0_6 = arith.constant 0 : index
    %c0_7 = arith.constant 0 : index
    %9 = vector.load %arg7[%c0_6, %c0_7] : memref<256x128xf32, #tpu.memory_space<vmem>>, vector<256x128xf32>
    tpu.vector_store %arg7[%c0_6, %c0_7], %8 {strides = array<i32>} : memref<256x128xf32, #tpu.memory_space<vmem>>, vector<256x128xf32>,
    %c0_i32_8 = arith.constant 0 : i32
    %10 = arith.cmpi eq, %arg2, %c0_i32_8 : i32
    %11 = arith.extui %10 : i1 to i32
    %c0_i32_9 = arith.constant 0 : i32
    %12 = arith.cmpi ne, %11, %c0_i32_9 : i32
    scf.if %12 {
      %c0_10 = arith.constant 0 : index
      %c0_11 = arith.constant 0 : index
      %13 = vector.load %arg7[%c0_10, %c0_11] : memref<256x128xf32, #tpu.memory_space<vmem>>, vector<256x128xf32>
      %c0_12 = arith.constant 0 : index
      %c0_13 = arith.constant 0 : index
      %14 = vector.load %arg5[%c0_12, %c0_13] : memref<1x128xf32, #tpu.memory_space<vmem>>, vector<1x128xf32>
      %15 = vector.broadcast %14 : vector<1x128xf32> to vector<256x128xf32>
      %16 = arith.addf %13, %15 : vector<256x128xf32>
      %17 = arith.truncf %16 : vector<256x128xf32> to vector<256x128xbf16>
      %c0_14 = arith.constant 0 : index
      %c0_15 = arith.constant 0 : index
      %18 = vector.load %arg6[%c0_14, %c0_15] : memref<256x128xbf16, #tpu.memory_space<vmem>>, vector<256x128xbf16>
      tpu.vector_store %arg6[%c0_14, %c0_15], %17 {strides = array<i32>} : memref<256x128xbf16, #tpu.memory_space<vmem>>, vector<256x128xbf16>,
    } else {
    }
    return
  }
  func.func @transform_0(%arg0: i32, %arg1: i32, %arg2: i32) -> (i32, i32) {
    %c0_i32 = arith.constant 0 : i32
    return %arg0, %arg2 : i32, i32
  }
  func.func @transform_1(%arg0: i32, %arg1: i32, %arg2: i32) -> (i32, i32) {
    %c0_i32 = arith.constant 0 : i32
    return %arg2, %arg1 : i32, i32
  }
  func.func @transform_2(%arg0: i32, %arg1: i32, %arg2: i32) -> (i32, i32) {
    %c0_i32 = arith.constant 0 : i32
    %c0_i32_0 = arith.constant 0 : i32
    return %c0_i32, %arg1 : i32, i32
  }
  func.func @transform_3(%arg0: i32, %arg1: i32, %arg2: i32) -> (i32, i32) {
    %c0_i32 = arith.constant 0 : i32
    return %arg0, %arg1 : i32, i32
  }
}

</mosaic_0001>

<bundles_post_ra>
// kernel: tpu_custom_call.1
= control target key start
LH: loop header
LB: loop body
LE: loop exit
PB: predicated region body
PF: predicated region fallthrough
CT: control target
= control target key end

     0   :  { %8 = vsyncpa [#allocation4], 0  ;;  %s1150_s0 = inlined_call_operand.hbm [shape: f32[256,128], index: 0, kind: input, shape index: {}]   ;;  %s1151_s1 = inlined_call_operand.hbm [shape: bf16[128,128], index: 1, kind: input, shape index: {}]   ;;  %s1152_s2 = inlined_call_operand.vmem [shape: f32[1,128], index: 2, kind: input, shape index: {}]   ;;  %s1153_s3 = inlined_call_operand.hbm [shape: bf16[256,128], index: 3, kind: output, shape index: {}]  }
   0x1   :  { %9 = vsyncpa [#allocation7], 0 }
   0x2   :  { %10 = vsyncpa [#allocation5], 0  ;;  %s1044_s12 = smov [#allocation3]   ;;  %s972_s16 = scalar_lea.hbm %s1150_s0, 4096 }
   0x3   :  { %s16_s13 = sshll.u32 %s1044_s12, 4  ;;  %p973_p0 = scmp.ne.s32.totalorder %s1150_s0, %s972_s16  ;;  %s17_s13 = int_to_ptr.vmem [resolvable:$true] %s16_s13 }
   0x4   :  { %p976_p1 = scmp.lt.u32.totalorder %s972_s16, %s1150_s0 }
   0x6   :  { %p978_p2 = pnand %p976_p1, %p973_p0 }
   0x8   :  { %981 = shalt.err (!%p978_p2)
}
   0x9   :  { %s982_s21 = scalar_lea.vmem %s17_s13, 4096  ;;  %p987_p4 = scmp.lt.s32.totalorder %s17_s13, %s17_s13 }
   0xa   :  { %p983_p3 = scmp.ne.s32.totalorder %s17_s13, %s982_s21  ;;  %p988_p5 = scmp.lt.s32.totalorder %s982_s21, %s982_s21 }
   0xc   :  { %p989_p6 = por %p988_p5, %p987_p4 }
   0xe   :  { %p990_p7 = pnand %p989_p6, %p983_p3 }
  0x10   :  { %993 = shalt.err (!%p990_p7)
}
  0x11   :  { %s1045_s22 = smov 128   ;;  %s1046_s23 = smov 8  }
  0x12   :  { %22 = dma.hbm_to_vmem [thread:$0]  %s1150_s0, 4096, %s17_s13, [#allocation4], %s1045_s22, %s1045_s22, %s1046_s23  }
  0x13   :  { %s1047_s26 = smov [#allocation6]   ;;  %s994_s30 = scalar_lea.hbm %s1151_s1, 1024 }
  0x14   :  { %s28_s27 = sshll.u32 %s1047_s26, 4  ;;  %p995_p8 = scmp.ne.s32.totalorder %s1151_s1, %s994_s30  ;;  %s29_s27 = int_to_ptr.vmem [resolvable:$true] %s28_s27 }
  0x15   :  { %p998_p9 = scmp.lt.u32.totalorder %s994_s30, %s1151_s1 }
  0x17   :  { %p1000_p10 = pnand %p998_p9, %p995_p8 }
  0x19   :  { %1003 = shalt.err (!%p1000_p10)
}
  0x1a   :  { %s1004_s8 = scalar_lea.vmem %s29_s27, 1024  ;;  %p1009_p12 = scmp.lt.s32.totalorder %s29_s27, %s29_s27 }
  0x1b   :  { %p1005_p11 = scmp.ne.s32.totalorder %s29_s27, %s1004_s8  ;;  %p1010_p13 = scmp.lt.s32.totalorder %s1004_s8, %s1004_s8 }
  0x1d   :  { %p1011_p0 = por %p1010_p13, %p1009_p12 }
  0x1f   :  { %p1012_p1 = pnand %p1011_p0, %p1005_p11 }
  0x21   :  { %1015 = shalt.err (!%p1012_p1)
}
  0x22   :  { %s1048_s0 = smov 64   ;;  %s1049_s9 = smov 4  }
  0x23   :  { %34 = dma.hbm_to_vmem [thread:$0]  %s1151_s1, 1024, %s29_s27, [#allocation7], %s1048_s0, %s1048_s0, %s1049_s9  }
  0x24   :  { %1038 = dma.done.wait [#allocation4], 4096  }
  0x25   :  { %1039 = vsyncadd [#allocation4], 4294963200 }
  0x26   :  { %1040 = dma.done.wait [#allocation7], 1024  }
  0x27   :  { %1041 = vsyncadd [#allocation7], 4294966272  ;;  %v964_v0 = vld [vmem:[#allocation6] sm:$0xff]   ;;  %v965_v1 = vld [vmem:[#allocation6 + $0x8] sm:$0xff]  }
  0x28   :  { %893 = vmatprep.subr.bf16.mxu0 %v964_v0  ;;  %941 = vmatprep.subr.bf16.mxu1 %v964_v0  ;;  %v966_v2 = vld [vmem:[#allocation6 + $0x10] sm:$0xff]   ;;  %v967_v3 = vld [vmem:[#allocation6 + $0x18] sm:$0xff]   ;;  %v112_v4 = vld [vmem:[#allocation3] sm:$0xff] }
  0x29   :  { %894 = vmatpush3.bf16.msra.mxu0 %v964_v0  ;;  %949 = vmatpush3.bf16.msra.mxu1 %v964_v0  ;;  %v113_v5 = vld [vmem:[#allocation3 + $0x8] sm:$0xff]  ;;  %v128_v6 = vld [vmem:[#allocation3 + $0x80] sm:$0xff]  ;;  %v970_v12 = vld [vmem:[#allocation6 + $0x30] sm:$0xff]  }
  0x2a   :  { %895 = vmatprep.subr.bf16.mxu0 %v965_v1  ;;  %942 = vmatprep.subr.bf16.mxu1 %v965_v1  ;;  %v144_v7 = vpack.c.bf16 %v113_v5, %v112_v4  ;;  %v129_v8 = vld [vmem:[#allocation3 + $0x88] sm:$0xff]  ;;  %v968_v10 = vld [vmem:[#allocation6 + $0x20] sm:$0xff]   ;;  %v971_v13 = vld [vmem:[#allocation6 + $0x38] sm:$0xff]  }
  0x2b   :  { %v152_v9 = vpack.c.bf16 %v129_v8, %v128_v6  ;;  %v969_v11 = vld [vmem:[#allocation6 + $0x28] sm:$0xff]   ;;  %v114_v14 = vld [vmem:[#allocation3 + $0x10] sm:$0xff]  ;;  %v115_v15 = vld [vmem:[#allocation3 + $0x18] sm:$0xff] }
  0x2c   :  { %909 = vmatprep.mubr.bf16.mxu0 %v144_v7  ;;  %v130_v16 = vld [vmem:[#allocation3 + $0x90] sm:$0xff]  ;;  %v131_v17 = vld [vmem:[#allocation3 + $0x98] sm:$0xff]  ;;  %v116_v18 = vld [vmem:[#allocation3 + $0x20] sm:$0xff]  ;;  %v145_v22 = vpack.c.bf16 %v115_v15, %v114_v14 }
  0x2d   :  { %896 = vmatpush3.bf16.msra.mxu0 %v965_v1  ;;  %950 = vmatpush3.bf16.msra.mxu1 %v965_v1  ;;  %v117_v19 = vld [vmem:[#allocation3 + $0x28] sm:$0xff]  ;;  %v132_v20 = vld [vmem:[#allocation3 + $0xa0] sm:$0xff]  ;;  %v153_v23 = vpack.c.bf16 %v131_v17, %v130_v16  ;;  %v118_v26 = vld [vmem:[#allocation3 + $0x30] sm:$0xff] }
  0x2e   :  { %897 = vmatprep.subr.bf16.mxu0 %v966_v2  ;;  %943 = vmatprep.subr.bf16.mxu1 %v966_v2  ;;  %v133_v21 = vld [vmem:[#allocation3 + $0xa8] sm:$0xff]  ;;  %v146_v24 = vpack.c.bf16 %v117_v19, %v116_v18  ;;  %v119_v27 = vld [vmem:[#allocation3 + $0x38] sm:$0xff]  ;;  %v134_v28 = vld [vmem:[#allocation3 + $0xb0] sm:$0xff] }
  0x2f   :  { %925 = vmatprep.mubr.bf16.mxu1 %v152_v9  ;;  %v154_v25 = vpack.c.bf16 %v133_v21, %v132_v20  ;;  %v135_v29 = vld [vmem:[#allocation3 + $0xb8] sm:$0xff]  ;;  %v120_v30 = vld [vmem:[#allocation3 + $0x40] sm:$0xff]  ;;  %v121_v31 = vld [vmem:[#allocation3 + $0x48] sm:$0xff]  ;;  %v147_v34 = vpack.c.bf16 %v119_v27, %v118_v26 }
  0x30   :  { %v136_v32 = vld [vmem:[#allocation3 + $0xc0] sm:$0xff]  ;;  %v137_v33 = vld [vmem:[#allocation3 + $0xc8] sm:$0xff]  ;;  %v155_v35 = vpack.c.bf16 %v135_v29, %v134_v28  ;;  %v148_v36 = vpack.c.bf16 %v121_v31, %v120_v30  ;;  %v122_v38 = vld [vmem:[#allocation3 + $0x50] sm:$0xff] }
  0x31   :  { %898 = vmatpush3.bf16.msra.mxu0 %v966_v2  ;;  %951 = vmatpush3.bf16.msra.mxu1 %v966_v2  ;;  %v156_v37 = vpack.c.bf16 %v137_v33, %v136_v32  ;;  %v123_v39 = vld [vmem:[#allocation3 + $0x58] sm:$0xff]  ;;  %v138_v40 = vld [vmem:[#allocation3 + $0xd0] sm:$0xff]  ;;  %v124_v42 = vld [vmem:[#allocation3 + $0x60] sm:$0xff] }
  0x32   :  { %899 = vmatprep.subr.bf16.mxu0 %v967_v3  ;;  %944 = vmatprep.subr.bf16.mxu1 %v967_v3  ;;  %v139_v41 = vld [vmem:[#allocation3 + $0xd8] sm:$0xff]  ;;  %v125_v43 = vld [vmem:[#allocation3 + $0x68] sm:$0xff]  ;;  %v140_v44 = vld [vmem:[#allocation3 + $0xe0] sm:$0xff]  ;;  %v149_v46 = vpack.c.bf16 %v123_v39, %v122_v38 }
  0x33   :  { %v141_v45 = vld [vmem:[#allocation3 + $0xe8] sm:$0xff]  ;;  %v157_v47 = vpack.c.bf16 %v139_v41, %v138_v40  ;;  %v150_v48 = vpack.c.bf16 %v125_v43, %v124_v42  ;;  %v126_v50 = vld [vmem:[#allocation3 + $0x70] sm:$0xff]  ;;  %v127_v51 = vld [vmem:[#allocation3 + $0x78] sm:$0xff] }
  0x34   :  { %v158_v49 = vpack.c.bf16 %v141_v45, %v140_v44  ;;  %v142_v52 = vld [vmem:[#allocation3 + $0xf0] sm:$0xff]  ;;  %v143_v53 = vld [vmem:[#allocation3 + $0xf8] sm:$0xff]  ;;  %v151_v54 = vpack.c.bf16 %v127_v51, %v126_v50  ;;  %v1101_v57 = vld [vmem:[%s1152_s2] ss:$0 sm:$0xff]  ;;  %s1050_s2 = smov [#allocation8]  }
  0x35   :  { %900 = vmatpush3.bf16.msra.mxu0 %v967_v3  ;;  %952 = vmatpush3.bf16.msra.mxu1 %v967_v3  ;;  %v159_v55 = vpack.c.bf16 %v143_v53, %v142_v52  ;;  %s688_s13 = sshll.u32 %s1050_s2, 4  ;;  %s689_s13 = int_to_ptr.vmem [resolvable:$true] %s688_s13 }
  0x36   :  { %901 = vmatprep.subr.bf16.mxu0 %v968_v10  ;;  %945 = vmatprep.subr.bf16.mxu1 %v968_v10  ;;  %s1016_s14 = scalar_lea.vmem %s689_s13, 2048  ;;  %p1021_p3 = scmp.lt.s32.totalorder %s689_s13, %s689_s13 }
  0x37   :  { %p1017_p2 = scmp.ne.s32.totalorder %s689_s13, %s1016_s14  ;;  %p1022_p4 = scmp.lt.s32.totalorder %s1016_s14, %s1016_s14 }
  0x39   :  { %902 = vmatpush3.bf16.msra.mxu0 %v968_v10  ;;  %953 = vmatpush3.bf16.msra.mxu1 %v968_v10  ;;  %p1023_p5 = por %p1022_p4, %p1021_p3 }
  0x3a   :  { %903 = vmatprep.subr.bf16.mxu0 %v969_v11  ;;  %946 = vmatprep.subr.bf16.mxu1 %v969_v11 }
  0x3b   :  { %p1024_p6 = pnand %p1023_p5, %p1017_p2 }
  0x3d   :  { %904 = vmatpush3.bf16.msra.mxu0 %v969_v11  ;;  %954 = vmatpush3.bf16.msra.mxu1 %v969_v11 }
  0x3e   :  { %905 = vmatprep.subr.bf16.mxu0 %v970_v12  ;;  %947 = vmatprep.subr.bf16.mxu1 %v970_v12 }
  0x41   :  { %906 = vmatpush3.bf16.msra.mxu0 %v970_v12  ;;  %955 = vmatpush3.bf16.msra.mxu1 %v970_v12 }
  0x42   :  { %907 = vmatprep.subr.bf16.mxu0 %v971_v13  ;;  %948 = vmatprep.subr.bf16.mxu1 %v971_v13 }
  0x45   :  { %908 = vmatpush3.bf16.msra.mxu0 %v971_v13  ;;  %956 = vmatpush3.bf16.msra.mxu1 %v971_v13 }
  0x48   :  { %910 = vmatmul.mubr.bf16.vlgmr.msra.gmra.mrb[0].mxu0 %v145_v22  ;;  %926 = vmatmul.mubr.bf16.vlgmr.msra.gmra.mrb[0].mxu1 %v153_v23 }
  0x49   :  { %913 = vmatprep.mubr.bf16.mxu0 %v146_v24  ;;  %929 = vmatprep.mubr.bf16.mxu1 %v154_v25 }
  0x50   :  { %914 = vmatmul.mubr.bf16.gmra.mrb[4].mxu0 %v147_v34  ;;  %930 = vmatmul.mubr.bf16.gmra.mrb[4].mxu1 %v155_v35 }
  0x51   :  { %917 = vmatprep.mubr.bf16.mxu0 %v148_v36  ;;  %933 = vmatprep.mubr.bf16.mxu1 %v156_v37 }
  0x58   :  { %918 = vmatmul.mubr.bf16.gmra.mrb[8].mxu0 %v149_v46  ;;  %934 = vmatmul.mubr.bf16.gmra.mrb[8].mxu1 %v157_v47 }
  0x59   :  { %921 = vmatprep.mubr.bf16.mxu0 %v150_v48  ;;  %937 = vmatprep.mubr.bf16.mxu1 %v158_v49 }
  0x60   :  { %922 = vmatmul.mubr.bf16.gmra.mrb[12].mxu0 %v151_v54  ;;  %938 = vmatmul.mubr.bf16.gmra.mrb[12].mxu1 %v159_v55 }
 0x11b   :  { %v911_v56 = vpop.f32.mrb[0].mxu0  ;;  %v927_v58 = vpop.f32.mrb[0].mxu1 }
 0x11c   :  { %v258_v59 = vpop.f32.mrb[1].mxu0  ;;  %v322_v60 = vpop.f32.mrb[1].mxu1  ;;  %v493_v63 = vadd.f32 %v911_v56, %v1101_v57  ;;  %v509_v0 = vadd.f32 %v927_v58, %v1101_v57 }
 0x11d   :  { %v912_v61 = vpop.f32.mrb[2].mxu0  ;;  %v928_v62 = vpop.f32.mrb[2].mxu1  ;;  %v491_v5 = vadd.f32 %v1101_v57, %v258_v59  ;;  %v507_v6 = vadd.f32 %v1101_v57, %v322_v60 }
 0x11e   :  { %v494_v1 = vadd.f32 %v912_v61, %v1101_v57  ;;  %v510_v2 = vadd.f32 %v928_v62, %v1101_v57  ;;  %v261_v3 = vpop.f32.mrb[3].mxu0  ;;  %v325_v4 = vpop.f32.mrb[3].mxu1 }
 0x11f   :  { %v492_v7 = vadd.f32 %v1101_v57, %v261_v3  ;;  %v508_v8 = vadd.f32 %v1101_v57, %v325_v4 }
 0x120   :  { %v782_v9 = vpack.c.bf16 %v494_v1, %v493_v63  ;;  %v822_v10 = vpack.c.bf16 %v510_v2, %v509_v0 }
 0x121   :  { %v777_v11 = vpack.c.bf16 %v492_v7, %v491_v5  ;;  %v817_v12 = vpack.c.bf16 %v508_v8, %v507_v6 }
 0x122   :  { %854 = vst [vmem:[#allocation8 + $0x8] sm:$0xff] %v782_v9   ;;  %862 = vst [vmem:[#allocation8 + $0x48] sm:$0xff] %v822_v10  }
 0x123   :  { %778 = vst [vmem:[#allocation8] sm:$0xff] %v777_v11   ;;  %861 = vst [vmem:[#allocation8 + $0x40] sm:$0xff] %v817_v12   ;;  %v915_v13 = vpop.f32.mrb[4].mxu0  ;;  %v931_v14 = vpop.f32.mrb[4].mxu1 }
 0x124   :  { %v274_v15 = vpop.f32.mrb[5].mxu0  ;;  %v338_v16 = vpop.f32.mrb[5].mxu1  ;;  %v497_v19 = vadd.f32 %v915_v13, %v1101_v57  ;;  %v513_v20 = vadd.f32 %v931_v14, %v1101_v57 }
 0x125   :  { %v916_v17 = vpop.f32.mrb[6].mxu0  ;;  %v932_v18 = vpop.f32.mrb[6].mxu1  ;;  %v495_v25 = vadd.f32 %v1101_v57, %v274_v15  ;;  %v511_v26 = vadd.f32 %v1101_v57, %v338_v16 }
 0x126   :  { %v498_v21 = vadd.f32 %v916_v17, %v1101_v57  ;;  %v514_v22 = vadd.f32 %v932_v18, %v1101_v57  ;;  %v277_v23 = vpop.f32.mrb[7].mxu0  ;;  %v341_v24 = vpop.f32.mrb[7].mxu1 }
 0x127   :  { %v496_v27 = vadd.f32 %v1101_v57, %v277_v23  ;;  %v512_v28 = vadd.f32 %v1101_v57, %v341_v24 }
 0x128   :  { %v792_v29 = vpack.c.bf16 %v498_v21, %v497_v19  ;;  %v832_v30 = vpack.c.bf16 %v514_v22, %v513_v20 }
 0x129   :  { %v787_v31 = vpack.c.bf16 %v496_v27, %v495_v25  ;;  %v827_v32 = vpack.c.bf16 %v512_v28, %v511_v26 }
 0x12a   :  { %856 = vst [vmem:[#allocation8 + $0x18] sm:$0xff] %v792_v29   ;;  %864 = vst [vmem:[#allocation8 + $0x58] sm:$0xff] %v832_v30  }
 0x12b   :  { %855 = vst [vmem:[#allocation8 + $0x10] sm:$0xff] %v787_v31   ;;  %863 = vst [vmem:[#allocation8 + $0x50] sm:$0xff] %v827_v32   ;;  %v919_v33 = vpop.f32.mrb[8].mxu0  ;;  %v935_v34 = vpop.f32.mrb[8].mxu1 }
 0x12c   :  { %v290_v35 = vpop.f32.mrb[9].mxu0  ;;  %v354_v36 = vpop.f32.mrb[9].mxu1  ;;  %v501_v39 = vadd.f32 %v919_v33, %v1101_v57  ;;  %v517_v40 = vadd.f32 %v935_v34, %v1101_v57 }
 0x12d   :  { %v920_v37 = vpop.f32.mrb[10].mxu0  ;;  %v936_v38 = vpop.f32.mrb[10].mxu1  ;;  %v499_v45 = vadd.f32 %v1101_v57, %v290_v35  ;;  %v515_v46 = vadd.f32 %v1101_v57, %v354_v36 }
 0x12e   :  { %v502_v41 = vadd.f32 %v920_v37, %v1101_v57  ;;  %v518_v42 = vadd.f32 %v936_v38, %v1101_v57  ;;  %v293_v43 = vpop.f32.mrb[11].mxu0  ;;  %v357_v44 = vpop.f32.mrb[11].mxu1 }
 0x12f   :  { %v500_v47 = vadd.f32 %v1101_v57, %v293_v43  ;;  %v516_v48 = vadd.f32 %v1101_v57, %v357_v44 }
 0x130   :  { %v802_v49 = vpack.c.bf16 %v502_v41, %v501_v39  ;;  %v842_v50 = vpack.c.bf16 %v518_v42, %v517_v40 }
 0x131   :  { %v797_v51 = vpack.c.bf16 %v500_v47, %v499_v45  ;;  %v837_v52 = vpack.c.bf16 %v516_v48, %v515_v46 }
 0x132   :  { %858 = vst [vmem:[#allocation8 + $0x28] sm:$0xff] %v802_v49   ;;  %866 = vst [vmem:[#allocation8 + $0x68] sm:$0xff] %v842_v50  }
 0x133   :  { %857 = vst [vmem:[#allocation8 + $0x20] sm:$0xff] %v797_v51   ;;  %865 = vst [vmem:[#allocation8 + $0x60] sm:$0xff] %v837_v52   ;;  %v923_v53 = vpop.f32.mrb[12].mxu0  ;;  %v939_v54 = vpop.f32.mrb[12].mxu1 }
 0x134   :  { %v306_v55 = vpop.f32.mrb[13].mxu0  ;;  %v370_v56 = vpop.f32.mrb[13].mxu1  ;;  %v505_v60 = vadd.f32 %v923_v53, %v1101_v57  ;;  %v521_v61 = vadd.f32 %v939_v54, %v1101_v57 }
 0x135   :  { %v924_v58 = vpop.f32.mrb[14].mxu0  ;;  %v940_v59 = vpop.f32.mrb[14].mxu1  ;;  %v503_v2 = vadd.f32 %v1101_v57, %v306_v55  ;;  %v519_v3 = vadd.f32 %v1101_v57, %v370_v56 }
 0x136   :  { %v506_v62 = vadd.f32 %v924_v58, %v1101_v57  ;;  %v522_v63 = vadd.f32 %v940_v59, %v1101_v57  ;;  %v309_v0 = vpop.f32.mrb[15].mxu0  ;;  %v373_v1 = vpop.f32.mrb[15].mxu1 }
 0x137   :  { %v504_v4 = vadd.f32 %v1101_v57, %v309_v0  ;;  %v520_v5 = vadd.f32 %v1101_v57, %v373_v1 }
 0x138   :  { %v812_v6 = vpack.c.bf16 %v506_v62, %v505_v60  ;;  %v852_v7 = vpack.c.bf16 %v522_v63, %v521_v61 }
 0x139   :  { %v807_v8 = vpack.c.bf16 %v504_v4, %v503_v2  ;;  %v847_v9 = vpack.c.bf16 %v520_v5, %v519_v3 }
 0x13a   :  { %860 = vst [vmem:[#allocation8 + $0x38] sm:$0xff] %v812_v6   ;;  %868 = vst [vmem:[#allocation8 + $0x78] sm:$0xff] %v852_v7  }
 0x13b   :  { %859 = vst [vmem:[#allocation8 + $0x30] sm:$0xff] %v807_v8   ;;  %867 = vst [vmem:[#allocation8 + $0x70] sm:$0xff] %v847_v9  }
 0x13c   :  { %1027 = shalt.err (!%p1024_p6)
}
 0x13d   :  { %s1028_s17 = scalar_lea.hbm %s1153_s3, 2048 }
 0x13e   :  { %p1029_p7 = scmp.ne.s32.totalorder %s1153_s3, %s1028_s17  ;;  %p1032_p8 = scmp.lt.u32.totalorder %s1028_s17, %s1153_s3 }
 0x140   :  { %p1034_p9 = pnand %p1032_p8, %p1029_p7 }
 0x142   :  { %1037 = shalt.err (!%p1034_p9)
}
 0x143   :  { %694 = dma.vmem_to_hbm [thread:$0]  %s689_s13, 2048, %s1153_s3, [#allocation5], %s1048_s0, %s1048_s0, %s1049_s9  }
 0x144   :  { %1042 = dma.done.wait [#allocation5], 2048  }
 0x145   :  { %1043 = vsyncadd [#allocation5], 4294965248 }
 0x146   :  { %698 = vsyncpa [#allocation4], 1 }
 0x147   :  { %699 = vsyncpa [#allocation7], 1 }
 0x148   :  { %700 = vsyncpa [#allocation5], 1 }

</bundles_post_ra>
